<compile_context>
chip_gen: v7x
topology: tpu7x:2x2x1
jax: 0.10.0
libtpu: 0.0.40
codegen_flags: <defaults>
</compile_context>

<pallas_src>
import functools

import jax
import jax.numpy as jnp
from jax.experimental import pallas as pl
from jax.experimental.pallas import tpu as pltpu


def _ce2d_kernel(logits_ref, labels_ref, psum_ref, acc_ref, *, hw, tl):
    """One (C, tl) spatial chunk of one batch image.

    logits_ref, labels_ref : (1, C, tl) blocks in native dtype
    psum_ref               : (1, 1, 1) per-image partial sum (f32)
    acc_ref                : (C, tl) f32 vector accumulator (VMEM scratch)
    """
    l = pl.program_id(1)

    @pl.when(l == 0)
    def _():
        acc_ref[...] = jnp.zeros_like(acc_ref)

    x = logits_ref[0].astype(jnp.float32)   # (C, tl)
    y = labels_ref[0].astype(jnp.float32)   # (C, tl)

    # Mask the ragged last chunk (columns >= hw contribute exactly 0 and any
    # out-of-bounds garbage is replaced before it can reach the math).
    if hw % tl != 0:
        col = l * tl + jax.lax.broadcasted_iota(jnp.int32, x.shape, 1)
        valid = col < hw
        x = jnp.where(valid, x, 0.0)
        y = jnp.where(valid, y, 0.0)

    # log-softmax over the color axis (sublanes).
    m = jnp.max(x, axis=0, keepdims=True)                 # (1, tl)
    xs = x - m
    e = jnp.exp(xs)                                       # (C, tl)
    log_denom = jnp.log(jnp.sum(e, axis=0, keepdims=True))
    # Reference does masked_fill(softmax == 0, 1) before log -> term becomes 0
    # where the softmax underflows to exactly zero.
    log_p = jnp.where(e == 0.0, 0.0, xs - log_denom)

    # masked_fill(labels == 0, 1) before log -> term is 0 where label is 0.
    log_y = jnp.log(jnp.where(y == 0.0, 1.0, y))

    # Pure elementwise accumulation; no per-step cross-lane reduce.
    acc_ref[...] += (log_p - log_y) * y

    @pl.when(l == pl.num_programs(1) - 1)
    def _():
        psum_ref[0] = jnp.sum(acc_ref[...], keepdims=True)


@functools.partial(jax.jit, static_argnames=("max_block_cols",))
def cross_entropy_loss_2d(outputs, labels, max_block_cols=None):
    """outputs, labels: (B, C, H, W). Returns the scalar loss (f32)."""
    B, C, H, W = outputs.shape
    HW = H * W
    N = B * HW

    # Natural layout: contiguous reshape only (no transpose / pad / cast).
    x = outputs.reshape(B, C, HW)
    y = labels.reshape(B, C, HW)

    itemsize = max(jnp.dtype(outputs.dtype).itemsize,
                   jnp.dtype(labels.dtype).itemsize)
    if max_block_cols is None:
        # ~1 MiB per input block; lane dim a multiple of 128.
        cap = ((1 << 20) // max(C * itemsize, 1)) // 128 * 128
        cap = max(128, min(16384, cap))
    else:
        cap = max(128, (int(max_block_cols) // 128) * 128)

    hw_aligned = pl.cdiv(HW, 128) * 128
    # If the whole spatial extent fits under the cap, take it exactly (block
    # last dim == full array dim is always legal); otherwise use a 128-aligned
    # chunk and mask the ragged tail in-kernel.
    tl = HW if hw_aligned <= cap else cap
    n_chunks = pl.cdiv(HW, tl)

    kernel = functools.partial(_ce2d_kernel, hw=HW, tl=tl)

    partials = pl.pallas_call(
        kernel,
        out_shape=jax.ShapeDtypeStruct((B, 1, 1), jnp.float32),
        grid_spec=pltpu.PrefetchScalarGridSpec(
            num_scalar_prefetch=0,
            grid=(B, n_chunks),
            in_specs=[
                pl.BlockSpec((1, C, tl), lambda b, l: (b, 0, l)),
                pl.BlockSpec((1, C, tl), lambda b, l: (b, 0, l)),
            ],
            out_specs=pl.BlockSpec((1, 1, 1), lambda b, l: (b, 0, 0)),
            scratch_shapes=[pltpu.VMEM((C, tl), jnp.float32)],
        ),
        compiler_params=pltpu.CompilerParams(
            dimension_semantics=("parallel", "arbitrary"),
        ),
    )(x, y)

    return -jnp.sum(partials) / jnp.float32(N)


def _reference(outputs, labels):
    B, C, H, W = outputs.shape
    N = B * H * W
    x = jnp.transpose(outputs, (0, 2, 3, 1)).reshape(N, C).astype(jnp.float32)
    y = jnp.transpose(labels, (0, 2, 3, 1)).reshape(N, C).astype(jnp.float32)
    p = jax.nn.softmax(x, axis=1)
    log_p = jnp.log(jnp.where(p == 0.0, 1.0, p))
    log_y = jnp.log(jnp.where(y == 0.0, 1.0, y))
    return -jnp.sum((log_p - log_y) * y) / N


if __name__ == "__main__":
    key = jax.random.PRNGKey(0)

    def make_inputs(k, shape):
        k_out, k_lab = jax.random.split(k)
        out = jax.random.normal(k_out, shape, dtype=jnp.float32)
        raw = jax.random.normal(k_lab, shape, dtype=jnp.float32)
        lab = jax.nn.softmax(raw, axis=1)
        lab = jnp.where(lab < 0.1, 0.0, lab)   # exercise masked_fill(labels==0)
        lab = lab / jnp.maximum(jnp.sum(lab, axis=1, keepdims=True), 1e-12)
        return out, lab

    k1, k2 = jax.random.split(key)

    # 1) Main small shape: single chunk per image.
    outputs, labels = make_inputs(k1, (2, 4, 16, 16))
    loss = jax.block_until_ready(cross_entropy_loss_2d(outputs, labels))
    ref = jax.block_until_ready(_reference(outputs, labels))
    assert jnp.allclose(loss, ref, rtol=1e-5, atol=1e-5), (loss, ref)

    # 2) Ragged spatial extent with forced small blocks: exercises chunked
    #    accumulation and in-kernel masking of the partially OOB last block.
    outputs2, labels2 = make_inputs(k2, (2, 4, 12, 12))
    loss2 = jax.block_until_ready(
        cross_entropy_loss_2d(outputs2, labels2, max_block_cols=128))
    ref2 = jax.block_until_ready(_reference(outputs2, labels2))
    assert jnp.allclose(loss2, ref2, rtol=1e-5, atol=1e-5), (loss2, ref2)

    print("KERNEL_OK")
</pallas_src>

<mosaic_0001>
module attributes {stable_mosaic.version = 11 : i64} {
  func.func @_ce2d_kernel(%arg0: i32, %arg1: i32, %arg2: memref<1x4x256xf32, #tpu.memory_space<vmem>>, %arg3: memref<1x4x256xf32, #tpu.memory_space<vmem>>, %arg4: memref<1x1x1xf32, #tpu.memory_space<vmem>>, %arg5: memref<4x256xf32, #tpu.memory_space<vmem>>) attributes {dimension_semantics = [#tpu.dimension_semantics<parallel>, #tpu.dimension_semantics<arbitrary>], iteration_bounds = array<i64: 2, 1>, scalar_prefetch = 0 : i64, scratch_operands = 1 : i64, tpu.core_type = #tpu.core_type<tc>, window_params = [{transform_indices = @transform_0, window_bounds = array<i64: 1, 4, 256>}, {transform_indices = @transform_1, window_bounds = array<i64: 1, 4, 256>}, {transform_indices = @transform_2, window_bounds = array<i64: 1, 1, 1>}]} {
    %c0_i32 = arith.constant 0 : i32
    %0 = arith.cmpi eq, %arg1, %c0_i32 : i32
    %1 = arith.extui %0 : i1 to i32
    %c0_i32_0 = arith.constant 0 : i32
    %2 = arith.cmpi ne, %1, %c0_i32_0 : i32
    scf.if %2 {
      %cst_17 = arith.constant 0.000000e+00 : f32
      %34 = vector.broadcast %cst_17 : f32 to vector<4x256xf32>
      %c0_18 = arith.constant 0 : index
      %c0_19 = arith.constant 0 : index
      %35 = vector.load %arg5[%c0_18, %c0_19] : memref<4x256xf32, #tpu.memory_space<vmem>>, vector<4x256xf32>
      tpu.vector_store %arg5[%c0_18, %c0_19], %34 {strides = array<i32>} : memref<4x256xf32, #tpu.memory_space<vmem>>, vector<4x256xf32>,
    } else {
    }
    %c0 = arith.constant 0 : index
    %c0_1 = arith.constant 0 : index
    %c0_2 = arith.constant 0 : index
    %3 = vector.load %arg2[%c0, %c0_1, %c0_2] : memref<1x4x256xf32, #tpu.memory_space<vmem>>, vector<1x4x256xf32>
    %4 = vector.shape_cast %3 : vector<1x4x256xf32> to vector<4x256xf32>
    %c0_3 = arith.constant 0 : index
    %c0_4 = arith.constant 0 : index
    %c0_5 = arith.constant 0 : index
    %5 = vector.load %arg3[%c0_3, %c0_4, %c0_5] : memref<1x4x256xf32, #tpu.memory_space<vmem>>, vector<1x4x256xf32>
    %6 = vector.shape_cast %5 : vector<1x4x256xf32> to vector<4x256xf32>
    %cst = arith.constant dense<0xFF800000> : vector<256xf32>
    %7 = vector.multi_reduction <maximumf>, %4, %cst [0] : vector<4x256xf32> to vector<256xf32>
    %8 = vector.shape_cast %7 : vector<256xf32> to vector<1x256xf32>
    %9 = vector.broadcast %8 : vector<1x256xf32> to vector<4x256xf32>
    %10 = arith.subf %4, %9 : vector<4x256xf32>
    %11 = math.exp %10 : vector<4x256xf32>
    %cst_6 = arith.constant dense<0.000000e+00> : vector<256xf32>
    %12 = vector.multi_reduction <add>, %11, %cst_6 [0] : vector<4x256xf32> to vector<256xf32>
    %13 = vector.shape_cast %12 : vector<256xf32> to vector<1x256xf32>
    %14 = math.log %13 : vector<1x256xf32>
    %cst_7 = arith.constant 0.000000e+00 : f32
    %15 = vector.broadcast %cst_7 : f32 to vector<4x256xf32>
    %16 = arith.cmpf oeq, %11, %15 : vector<4x256xf32>
    %17 = vector.broadcast %14 : vector<1x256xf32> to vector<4x256xf32>
    %18 = arith.subf %10, %17 : vector<4x256xf32>
    %cst_8 = arith.constant 0.000000e+00 : f32
    %19 = vector.broadcast %cst_8 : f32 to vector<4x256xf32>
    %20 = arith.select %16, %19, %18 : vector<4x256xi1>, vector<4x256xf32>
    %cst_9 = arith.constant 0.000000e+00 : f32
    %21 = vector.broadcast %cst_9 : f32 to vector<4x256xf32>
    %22 = arith.cmpf oeq, %6, %21 : vector<4x256xf32>
    %cst_10 = arith.constant 1.000000e+00 : f32
    %23 = vector.broadcast %cst_10 : f32 to vector<4x256xf32>
    %24 = arith.select %22, %23, %6 : vector<4x256xi1>, vector<4x256xf32>
    %25 = math.log %24 : vector<4x256xf32>
    %c0_11 = arith.constant 0 : index
    %c0_12 = arith.constant 0 : index
    %26 = vector.load %arg5[%c0_11, %c0_12] : memref<4x256xf32, #tpu.memory_space<vmem>>, vector<4x256xf32>
    %27 = arith.subf %20, %25 : vector<4x256xf32>
    %28 = arith.mulf %27, %6 : vector<4x256xf32>
    %29 = arith.addf %26, %28 : vector<4x256xf32>
    %c0_13 = arith.constant 0 : index
    %c0_14 = arith.constant 0 : index
    %30 = vector.load %arg5[%c0_13, %c0_14] : memref<4x256xf32, #tpu.memory_space<vmem>>, vector<4x256xf32>
    tpu.vector_store %arg5[%c0_13, %c0_14], %29 {strides = array<i32>} : memref<4x256xf32, #tpu.memory_space<vmem>>, vector<4x256xf32>,
    %c0_i32_15 = arith.constant 0 : i32
    %31 = arith.cmpi eq, %arg1, %c0_i32_15 : i32
    %32 = arith.extui %31 : i1 to i32
    %c0_i32_16 = arith.constant 0 : i32
    %33 = arith.cmpi ne, %32, %c0_i32_16 : i32
    scf.if %33 {
      %c0_17 = arith.constant 0 : index
      %c0_18 = arith.constant 0 : index
      %34 = vector.load %arg5[%c0_17, %c0_18] : memref<4x256xf32, #tpu.memory_space<vmem>>, vector<4x256xf32>
      %35 = vector.shape_cast %34 : vector<4x256xf32> to vector<1x4x256xf32>
      %cst_19 = arith.constant dense<0.000000e+00> : vector<1xf32>
      %36 = vector.multi_reduction <add>, %35, %cst_19 [1, 2] : vector<1x4x256xf32> to vector<1xf32>
      %37 = vector.shape_cast %36 : vector<1xf32> to vector<1x1x1xf32>
      %38 = vector.extract %37[0, 0, 0] : f32 from vector<1x1x1xf32>
      %39 = vector.broadcast %38 : f32 to vector<1x1xf32>
      %c0_20 = arith.constant 0 : index
      %c0_21 = arith.constant 0 : index
      %c0_22 = arith.constant 0 : index
      %40 = vector.load %arg4[%c0_20, %c0_21, %c0_22] : memref<1x1x1xf32, #tpu.memory_space<vmem>>, vector<1x1x1xf32>
      %41 = vector.shape_cast %40 : vector<1x1x1xf32> to vector<1x1xf32>
      %42 = vector.shape_cast %39 : vector<1x1xf32> to vector<1x1x1xf32>
      tpu.vector_store %arg4[%c0_20, %c0_21, %c0_22], %42 {strides = array<i32>} : memref<1x1x1xf32, #tpu.memory_space<vmem>>, vector<1x1x1xf32>,
    } else {
    }
    return
  }
  func.func @transform_0(%arg0: i32, %arg1: i32) -> (i32, i32, i32) {
    %c0_i32 = arith.constant 0 : i32
    %c0_i32_0 = arith.constant 0 : i32
    return %arg0, %c0_i32, %arg1 : i32, i32, i32
  }
  func.func @transform_1(%arg0: i32, %arg1: i32) -> (i32, i32, i32) {
    %c0_i32 = arith.constant 0 : i32
    %c0_i32_0 = arith.constant 0 : i32
    return %arg0, %c0_i32, %arg1 : i32, i32, i32
  }
  func.func @transform_2(%arg0: i32, %arg1: i32) -> (i32, i32, i32) {
    %c0_i32 = arith.constant 0 : i32
    %c0_i32_0 = arith.constant 0 : i32
    %c0_i32_1 = arith.constant 0 : i32
    return %arg0, %c0_i32, %c0_i32_0 : i32, i32, i32
  }
}

</mosaic_0001>

<bundles_post_ra>
// kernel: cross_entropy_loss_2d.1
= control target key start
LH: loop header
LB: loop body
LE: loop exit
PB: predicated region body
PF: predicated region fallthrough
CT: control target
= control target key end

     0   :  { %s461_s9 = smov 0   ;;  %s463_s10 = smov 0   ;;  %s511_s0 = inlined_call_operand.vmem [shape: f32[2,4,256], index: 0, kind: input, shape index: {}]   ;;  %s512_s1 = inlined_call_operand.vmem [shape: f32[2,4,256], index: 1, kind: input, shape index: {}]   ;;  %s513_s2 = inlined_call_operand.vmem [shape: f32[2,1,1], index: 2, kind: output, shape index: {}]  }
   0x1   :  { %s465_s11 = smov 0  }
   0x2 LB: > { %s24_s12 = sadd.s32 1, %s440_s10  ;;  %p378_p0 = scmp.ge.s32.totalorder %s444_s11, 1  ;;  %s444_s11 = sphi %s465_s11, %s12_s11   ;;  %s440_s10 = sphi %s463_s10, %s515_s10   ;;  %s436_s9 = sphi %s461_s9, %s514_s9  }
   0x3   : > { %p26_p1 = scmp.ge.s32.totalorder %s24_s12, 2  ;;  %p148_p2 = scmp.lt.s32.totalorder %s444_s11, 3 }
   0x5   : > { %s517_s12 = smov (%p26_p1, %s24_s12), 0  ;;  %p149_p3 = pnand %p378_p0, %p148_p2 }
   0x6   : > { %p182_p4 = scmp.lt.s32.totalorder (!%p149_p3), %s436_s9, 1  ;;  %vm214_vm0 = vcmask (!%p149_p3), 1043456   ;;  %vm293_vm3 = vcmask (!%p149_p3), 0  }
   0x7   : > { %152 = sbr.rel (%p149_p3) target bundleno = 298 (0x12a), region = 28 }
   0xe   : > { %s519_s9 = smov (!%p182_p4, %s436_s9), 1 }
   0xf   : > { %s385_s13 = sshll.u32 %s519_s9, 3  ;;  %s203_s22 = scalar_lea.vmem %s513_s2, %s519_s9 }
  0x10   : > { %s189_s16 = scalar_lea.vmem %s511_s0, %s385_s13  ;;  %s199_s19 = scalar_lea.vmem %s512_s1, %s385_s13 }
  0x11   : > { %v209_v0 = vld [vmem:[%s189_s16] sm:$0xff] }
  0x12   : > { %v212_v1 = vcombine.high %v209_v0, %v209_v0  ;;  %v215_v2 = vsel %vm214_vm0, %v209_v0, -inf  ;;  %v210_v28 = vld [vmem:[%s199_s19] sm:$0xff] }
  0x13   : > { %v216_v3 = vrot.slane %v215_v2, 4  ;;  %vm264_vm1 = vcmp.eq.f32.partialorder %v210_v28, 0.0 }
  0x14   : > { %v222_v4 = vsel %vm214_vm0, %v212_v1, -inf  ;;  %v265_v36 = vsel %vm264_vm1, 1.0, %v210_v28 }
  0x15   : > { %v217_v5 = vmax.f32 %v215_v2, %v216_v3  ;;  %v223_v6 = vrot.slane %v222_v4, 4 }
  0x17   : > { %v218_v7 = vrot.slane %v217_v5, 2  ;;  %v224_v8 = vmax.f32 %v222_v4, %v223_v6 }
  0x19   : > { %v219_v9 = vmax.f32 %v217_v5, %v218_v7  ;;  %v225_v10 = vrot.slane %v224_v8, 2 }
  0x1b   : > { %v220_v11 = vrot.slane %v219_v9, 1  ;;  %v226_v12 = vmax.f32 %v224_v8, %v225_v10 }
  0x1d   : > { %v221_v13 = vmax.f32 %v219_v9, %v220_v11  ;;  %v227_v14 = vrot.slane %v226_v12, 1 }
  0x1f   : > { %v228_v15 = vmax.f32 %v226_v12, %v227_v14 }
  0x21   : > { %v231_v16 = vcombine.low %v221_v13, %v228_v15 }
  0x23   : > { %v233_v17 = vsub.f32 %v209_v0, %v231_v16 }
  0x25   : > { %v234_v18 = vmul.f32 1.442695, %v233_v17 }
  0x27   : > { %414 = vpow2.f32 %v234_v18 }
  0x31   : > { %v415_v19 = vpop.eup %414 }
  0x32   : > { %v237_v20 = vcombine.high %v415_v19, %v415_v19  ;;  %v239_v21 = vsel %vm214_vm0, %v415_v19, 0.0  ;;  %vm257_vm2 = vcmp.eq.f32.partialorder %v415_v19, 0.0 }
  0x33   : > { %v240_v22 = vrot.slane %v239_v21, 4 }
  0x34   : > { %v246_v23 = vsel %vm214_vm0, %v237_v20, 0.0 }
  0x35   : > { %v241_v24 = vadd.f32 %v240_v22, %v239_v21  ;;  %v247_v25 = vrot.slane %v246_v23, 4 }
  0x37   : > { %v242_v26 = vrot.slane %v241_v24, 2  ;;  %v248_v27 = vadd.f32 %v247_v25, %v246_v23 }
  0x39   : > { %v243_v29 = vadd.f32 %v242_v26, %v241_v24  ;;  %v249_v30 = vrot.slane %v248_v27, 2 }
  0x3b   : > { %v244_v31 = vrot.slane %v243_v29, 1  ;;  %v250_v32 = vadd.f32 %v249_v30, %v248_v27 }
  0x3d   : > { %v245_v33 = vadd.f32 %v244_v31, %v243_v29  ;;  %v251_v34 = vrot.slane %v250_v32, 1 }
  0x3f   : > { %v252_v35 = vadd.f32 %v251_v34, %v250_v32  ;;  %416 = vlog2.f32 %v245_v33 }
  0x41   : > { %418 = vlog2.f32 %v252_v35 }
  0x42   : > { %420 = vlog2.f32 %v265_v36 }
  0x49   : > { %v417_v37 = vpop.eup %416 }
  0x4a   : > { %v254_v38 = vmul.f32 0.6931472, %v417_v37 }
  0x4b   : > { %v419_v39 = vpop.eup %418 }
  0x4c   : > { %v421_v40 = vpop.eup %420  ;;  %v256_v41 = vmul.f32 0.6931472, %v419_v39 }
  0x4d   : > { %v267_v43 = vmul.f32 0.6931472, %v421_v40 }
  0x4e   : > { %v260_v42 = vcombine.low %v254_v38, %v256_v41 }
  0x50   : > { %v262_v44 = vsub.f32 %v233_v17, %v260_v42 }
  0x52   : > { %v263_v45 = vsel %vm257_vm2, 0.0, %v262_v44 }
  0x53   : > { %v269_v46 = vsub.f32 %v263_v45, %v267_v43 }
  0x55   : > { %v270_v47 = vmul.f32 %v269_v46, %v210_v28 }
  0x57   : > { %v278_v48 = vcombine.high %v270_v47, %v270_v47  ;;  %v280_v49 = vsel %vm214_vm0, %v270_v47, 0.0 }
  0x59   : > { %v281_v50 = vsel %vm214_vm0, %v278_v48, 0.0 }
  0x5a   : > { %v282_v51 = vadd.f32 %v281_v50, %v280_v49 }
  0x5c   : > { %283 = vadd.xlane.f32.xlu0 %v282_v51 }
  0xe9   : > { %v284_v52 = vpop.xlane.xlu0 %283 }
  0xea   : > { %v285_v53 = vrot.slane %v284_v52, 4 }
  0xec   : > { %v286_v54 = vadd.f32 %v285_v53, %v284_v52 }
  0xee   : > { %v287_v55 = vrot.slane %v286_v54, 2 }
  0xf0   : > { %v288_v56 = vadd.f32 %v287_v55, %v286_v54 }
  0xf2   : > { %v289_v57 = vrot.slane %v288_v56, 1 }
  0xf4   : > { %v290_v58 = vadd.f32 %v289_v57, %v288_v56 }
  0xf6   : > { %387 = vpush %v290_v58 }
 0x127   : > { %s388_s23 = spop %387 }
 0x128   : > { %v292_v59 = vstv %s388_s23 }
 0x129   : > { %294 = vst.msk [vmem:[%s203_s22] sm:$0x1] %vm293_vm3, %v292_v59 }
 0x12a PF: > { %s12_s11 = sadd.s32 1, %s444_s11   ;;  %s514_s9 = smov %s440_s10 }
 0x12b   : > { %p9_p5 = scmp.ge.s32.totalorder %s12_s11, 4   ;;  %s515_s10 = smov %s517_s12 }
 0x12d   :  { %11 = sbr.rel (!%p9_p5) target bundleno = 2 (0x2), region = 69 }

</bundles_post_ra>
